<compile_context>
chip_gen: v7x
topology: tpu7x:2x2x1
jax: 0.10.0
libtpu: 0.0.40
codegen_flags: <defaults>
</compile_context>

<pallas_src>
import functools

import jax
import jax.numpy as jnp
from jax import lax
from jax.experimental import pallas as pl
from jax.experimental.pallas import tpu as pltpu


def _style_hallucination_kernel(x_ref, nm_ref, ns_ref, o_ref, *, hw):
    """Row-tiled normalization + re-styling.

    x_ref : (R, HWp)  rows = flattened (batch, channel), lanes = padded H*W
    nm_ref: (R, 1)    per-row target mean  (combine_w @ proto_mean)
    ns_ref: (R, 1)    per-row target std   (combine_w @ proto_std)
    o_ref : (R, HWp)  stylized output (padded lanes hold garbage, sliced off
                      by the wrapper)
    hw    : static number of valid spatial elements per row
    """
    x = x_ref[...].astype(jnp.float32)                       # (R, HWp) f32
    hw_pad = x.shape[1]

    # Padded lanes are zero, so a plain sum / hw gives the exact mean.
    mean = jnp.sum(x, axis=1, keepdims=True) * (1.0 / hw)    # (R, 1)
    diff = x - mean

    # Unbiased variance (matches torch.std default, ddof=1).
    # NOTE: hw == 1 yields NaN, exactly like the torch reference.
    inv_ddof = 1.0 / (hw - 1) if hw > 1 else float("nan")
    if hw_pad == hw:
        var = jnp.sum(diff * diff, axis=1, keepdims=True) * inv_ddof
    else:
        # Mask out the padded lanes (their diff would be -mean, not 0).
        lane = lax.broadcasted_iota(jnp.int32, x.shape, 1)
        diff_m = jnp.where(lane < hw, diff, 0.0)
        var = jnp.sum(diff_m * diff_m, axis=1, keepdims=True) * inv_ddof

    std = jnp.sqrt(var) + 1e-07                              # (R, 1)

    # Per-row scale vector instead of a full-tile divide.
    scale = ns_ref[...] * pl.reciprocal(std, approx=False)   # (R, 1)
    o_ref[...] = (diff * scale + nm_ref[...]).astype(o_ref.dtype)


def style_hallucination(x, combine_weights, proto_mean, proto_std,
                        *, vmem_budget_bytes=32 * 1024 * 1024):
    """x: (B, C, H, W); combine_weights: (B, K); proto_*: (K, C).

    Returns (x, x_new) exactly like the PyTorch module's forward.
    """
    B, C, H, W = x.shape
    HW = H * W
    rows = B * C
    orig_dtype = x.dtype
    itemsize = jnp.dtype(orig_dtype).itemsize

    x_flat = x.reshape(rows, HW)                       # keep original dtype

    # Hoisted style mixing: one (B,K)@(K,2C) XLA GEMM instead of per-row work
    # in the kernel.
    cw = combine_weights.astype(jnp.float32)
    proto = jnp.concatenate(
        [proto_mean.astype(jnp.float32), proto_std.astype(jnp.float32)],
        axis=1)                                        # (K, 2C)
    mixed = cw @ proto                                 # (B, 2C)
    new_mean = mixed[:, :C].reshape(rows, 1)
    new_std = mixed[:, C:].reshape(rows, 1)

    # Lane-dense slab: pad spatial axis to a multiple of 128 (zeros; handled
    # by the in-kernel mask so statistics stay exact).
    HW_pad = ((HW + 127) // 128) * 128
    if HW_pad != HW:
        x_flat = jnp.pad(x_flat, ((0, 0), (0, HW_pad - HW)))

    # Row tile: multiple of 8 sublanes; budget covers double-buffered in/out
    # plus an f32 working copy inside the kernel. Leaves headroom for v7x.
    bytes_per_row = 2 * (HW_pad * itemsize) * 2 + 3 * HW_pad * 4
    max_rows_tile = max(8, (vmem_budget_bytes // bytes_per_row) // 8 * 8)
    rows_tile = min(max_rows_tile, ((rows + 7) // 8) * 8)
    num_tiles = pl.cdiv(rows, rows_tile)
    rows_pad = num_tiles * rows_tile

    if rows_pad != rows:
        pad = rows_pad - rows
        x_flat = jnp.pad(x_flat, ((0, pad), (0, 0)))
        new_mean = jnp.pad(new_mean, ((0, pad), (0, 0)))
        new_std = jnp.pad(new_std, ((0, pad), (0, 0)))

    kernel = functools.partial(_style_hallucination_kernel, hw=HW)

    x_new_flat = pl.pallas_call(
        kernel,
        out_shape=jax.ShapeDtypeStruct((rows_pad, HW_pad), orig_dtype),
        grid_spec=pltpu.PrefetchScalarGridSpec(
            num_scalar_prefetch=0,
            grid=(num_tiles,),
            in_specs=[
                pl.BlockSpec((rows_tile, HW_pad), lambda i: (i, 0)),  # x rows
                pl.BlockSpec((rows_tile, 1), lambda i: (i, 0)),       # mean
                pl.BlockSpec((rows_tile, 1), lambda i: (i, 0)),       # std
            ],
            out_specs=pl.BlockSpec((rows_tile, HW_pad), lambda i: (i, 0)),
        ),
        compiler_params=pltpu.CompilerParams(
            dimension_semantics=("parallel",),
            vmem_limit_bytes=48 * 1024 * 1024,
        ),
    )(x_flat, new_mean, new_std)

    x_new = x_new_flat[:rows, :HW].reshape(B, C, H, W)
    return x, x_new


def _reference(x, combine_weights, proto_mean, proto_std):
    xf = x.astype(jnp.float32)
    x_mean = jnp.mean(xf, axis=(2, 3), keepdims=True)
    x_std = jnp.std(xf, axis=(2, 3), keepdims=True, ddof=1) + 1e-07
    x_norm = (xf - x_mean) / x_std
    new_mean = combine_weights @ proto_mean
    new_std = combine_weights @ proto_std
    x_new = x_norm * new_std[:, :, None, None] + new_mean[:, :, None, None]
    return x, x_new.astype(x.dtype)


if __name__ == "__main__":
    # Small shapes consistent with the module (style_dim == C).
    B, C = 2, 4
    base_style_num = 8
    concentration_coeff = 0.5

    key = jax.random.PRNGKey(0)
    k_x, k_dir, k_pm, k_ps, k_x2 = jax.random.split(key, 5)

    # Dirichlet sample (detached / no grad in torch; plain sample here).
    concentration = jnp.full((base_style_num,), concentration_coeff,
                             dtype=jnp.float32)
    combine_weights = jax.random.dirichlet(k_dir, concentration, shape=(B,))

    # Buffers are zero-initialized in __init__ and filled during training;
    # use deterministic random values here so the output is non-trivial.
    proto_mean = jax.random.normal(k_pm, (base_style_num, C), dtype=jnp.float32)
    proto_std = jax.random.uniform(k_ps, (base_style_num, C),
                                   dtype=jnp.float32, minval=0.5, maxval=1.5)

    # Case 1: H*W is a multiple of 128 (lane-dense fast path).
    x1 = jax.random.normal(k_x, (B, C, 16, 16), dtype=jnp.float32)
    x1_out, x1_new = style_hallucination(x1, combine_weights, proto_mean,
                                         proto_std)
    jax.block_until_ready((x1_out, x1_new))
    _, x1_ref = _reference(x1, combine_weights, proto_mean, proto_std)
    assert jnp.allclose(x1_out, x1), "identity output mismatch (case 1)"
    assert jnp.allclose(x1_new, x1_ref, atol=1e-5, rtol=1e-5), \
        "stylized output mismatch (case 1)"

    # Case 2: H*W not a multiple of 128 (masked / padded-lane path).
    x2 = jax.random.normal(k_x2, (B, C, 10, 10), dtype=jnp.float32)
    x2_out, x2_new = style_hallucination(x2, combine_weights, proto_mean,
                                         proto_std)
    jax.block_until_ready((x2_out, x2_new))
    _, x2_ref = _reference(x2, combine_weights, proto_mean, proto_std)
    assert jnp.allclose(x2_out, x2), "identity output mismatch (case 2)"
    assert jnp.allclose(x2_new, x2_ref, atol=1e-5, rtol=1e-5), \
        "stylized output mismatch (case 2)"

    print("KERNEL_OK")
</pallas_src>

<mosaic_0001>
module attributes {stable_mosaic.version = 11 : i64} {
  func.func @_style_hallucination_kernel(%arg0: i32, %arg1: memref<8x256xf32, #tpu.memory_space<vmem>>, %arg2: memref<8x1xf32, #tpu.memory_space<vmem>>, %arg3: memref<8x1xf32, #tpu.memory_space<vmem>>, %arg4: memref<8x256xf32, #tpu.memory_space<vmem>>) attributes {dimension_semantics = [#tpu.dimension_semantics<parallel>], iteration_bounds = array<i64: 1>, scalar_prefetch = 0 : i64, scratch_operands = 0 : i64, tpu.core_type = #tpu.core_type<tc>, window_params = [{transform_indices = @transform_0, window_bounds = array<i64: 8, 256>}, {transform_indices = @transform_1, window_bounds = array<i64: 8, 1>}, {transform_indices = @transform_2, window_bounds = array<i64: 8, 1>}, {transform_indices = @transform_3, window_bounds = array<i64: 8, 256>}]} {
    %c0 = arith.constant 0 : index
    %c0_0 = arith.constant 0 : index
    %0 = vector.load %arg1[%c0, %c0_0] : memref<8x256xf32, #tpu.memory_space<vmem>>, vector<8x256xf32>
    %cst = arith.constant dense<0.000000e+00> : vector<8xf32>
    %1 = vector.multi_reduction <add>, %0, %cst [1] : vector<8x256xf32> to vector<8xf32>
    %2 = vector.shape_cast %1 : vector<8xf32> to vector<8x1xf32>
    %cst_1 = arith.constant 3.906250e-03 : f32
    %3 = vector.broadcast %cst_1 : f32 to vector<8x1xf32>
    %4 = arith.mulf %2, %3 : vector<8x1xf32>
    %5 = vector.broadcast %4 : vector<8x1xf32> to vector<8x256xf32>
    %6 = arith.subf %0, %5 : vector<8x256xf32>
    %7 = arith.mulf %6, %6 : vector<8x256xf32>
    %cst_2 = arith.constant dense<0.000000e+00> : vector<8xf32>
    %8 = vector.multi_reduction <add>, %7, %cst_2 [1] : vector<8x256xf32> to vector<8xf32>
    %9 = vector.shape_cast %8 : vector<8xf32> to vector<8x1xf32>
    %cst_3 = arith.constant 0.00392156886 : f32
    %10 = vector.broadcast %cst_3 : f32 to vector<8x1xf32>
    %11 = arith.mulf %9, %10 : vector<8x1xf32>
    %12 = math.sqrt %11 : vector<8x1xf32>
    %cst_4 = arith.constant 1.000000e-07 : f32
    %13 = vector.broadcast %cst_4 : f32 to vector<8x1xf32>
    %14 = arith.addf %12, %13 : vector<8x1xf32>
    %c0_5 = arith.constant 0 : index
    %c0_6 = arith.constant 0 : index
    %15 = vector.load %arg3[%c0_5, %c0_6] : memref<8x1xf32, #tpu.memory_space<vmem>>, vector<8x1xf32>
    %16 = tpu.reciprocal %14 : vector<8x1xf32> -> vector<8x1xf32>
    %17 = arith.mulf %15, %16 : vector<8x1xf32>
    %18 = vector.broadcast %17 : vector<8x1xf32> to vector<8x256xf32>
    %19 = arith.mulf %6, %18 : vector<8x256xf32>
    %c0_7 = arith.constant 0 : index
    %c0_8 = arith.constant 0 : index
    %20 = vector.load %arg2[%c0_7, %c0_8] : memref<8x1xf32, #tpu.memory_space<vmem>>, vector<8x1xf32>
    %21 = vector.broadcast %20 : vector<8x1xf32> to vector<8x256xf32>
    %22 = arith.addf %19, %21 : vector<8x256xf32>
    %c0_9 = arith.constant 0 : index
    %c0_10 = arith.constant 0 : index
    %23 = vector.load %arg4[%c0_9, %c0_10] : memref<8x256xf32, #tpu.memory_space<vmem>>, vector<8x256xf32>
    tpu.vector_store %arg4[%c0_9, %c0_10], %22 {strides = array<i32>} : memref<8x256xf32, #tpu.memory_space<vmem>>, vector<8x256xf32>,
    return
  }
  func.func @transform_0(%arg0: i32) -> (i32, i32) {
    %c0_i32 = arith.constant 0 : i32
    %c0_i32_0 = arith.constant 0 : i32
    return %arg0, %c0_i32 : i32, i32
  }
  func.func @transform_1(%arg0: i32) -> (i32, i32) {
    %c0_i32 = arith.constant 0 : i32
    %c0_i32_0 = arith.constant 0 : i32
    return %arg0, %c0_i32 : i32, i32
  }
  func.func @transform_2(%arg0: i32) -> (i32, i32) {
    %c0_i32 = arith.constant 0 : i32
    %c0_i32_0 = arith.constant 0 : i32
    return %arg0, %c0_i32 : i32, i32
  }
  func.func @transform_3(%arg0: i32) -> (i32, i32) {
    %c0_i32 = arith.constant 0 : i32
    %c0_i32_0 = arith.constant 0 : i32
    return %arg0, %c0_i32 : i32, i32
  }
}

</mosaic_0001>

<bundles_post_ra>
// kernel: tpu_custom_call.1
= control target key start
LH: loop header
LB: loop body
LE: loop exit
PB: predicated region body
PF: predicated region fallthrough
CT: control target
= control target key end

     0   :  { %s149_s0 = inlined_call_operand.vmem [shape: f32[8,256], index: 0, kind: input, shape index: {}]   ;;  %s150_s1 = inlined_call_operand.vmem [shape: f32[8,1], index: 1, kind: input, shape index: {}]   ;;  %s151_s2 = inlined_call_operand.vmem [shape: f32[8,1], index: 2, kind: input, shape index: {}]   ;;  %s152_s3 = inlined_call_operand.hbm [shape: f32[8,256], index: 3, kind: output, shape index: {}]  }
   0x1   :  { %v15_v0 = vld [vmem:[%s149_s0] sm:$0xff]  ;;  %v16_v1 = vld [vmem:[%s149_s0 + $0x8] sm:$0xff] }
   0x2   :  { %8 = vsyncpa [#allocation3], 0  ;;  %v17_v2 = vadd.f32 %v16_v1, %v15_v0  ;;  %v103_v10 = vmov 0   ;;  %v37_v19 = vld [vmem:[%s151_s2] sm:$0xff]  ;;  %s104_s19 = smov [#allocation2]  }
   0x3   :  { %73 = vset.pattern.permute.xlu1 %v103_v10  ;;  %74 = vset.pattern.permute.xlu0 %v103_v10  ;;  %v47_v22 = vld [vmem:[%s150_s1] sm:$0xff]  ;;  %s63_s20 = sshll.u32 %s104_s19, 4  ;;  %s64_s20 = int_to_ptr.vmem [resolvable:$true] %s63_s20 }
   0x4   :  { %18 = vadd.xlane.f32.xlu0 %v17_v2  ;;  %s79_s2 = scalar_lea.vmem %s64_s20, 256  ;;  %p84_p1 = scmp.lt.s32.totalorder %s64_s20, %s64_s20 }
   0x5   :  { %p80_p0 = scmp.ne.s32.totalorder %s64_s20, %s79_s2  ;;  %p85_p2 = scmp.lt.s32.totalorder %s79_s2, %s79_s2 }
   0x7   :  { %p86_p3 = por %p85_p2, %p84_p1 }
   0x9   :  { %p87_p4 = pnand %p86_p3, %p80_p0 }
  0x91   :  { %v19_v3 = vpop.xlane.xlu0 %18 }
  0x92   :  { %v20_v4 = vmul.f32 0.00390625, %v19_v3 }
  0x94   :  { %v21_v5 = vsub.f32 %v15_v0, %v20_v4  ;;  %v22_v6 = vsub.f32 %v16_v1, %v20_v4 }
  0x96   :  { %v23_v7 = vmul.f32 %v21_v5, %v21_v5  ;;  %v24_v8 = vmul.f32 %v22_v6, %v22_v6 }
  0x98   :  { %v25_v9 = vadd.f32 %v24_v8, %v23_v7 }
  0x9a   :  { %26 = vadd.xlane.f32.xlu0 %v25_v9 }
 0x127   :  { %v27_v11 = vpop.xlane.xlu0 %26 }
 0x128   :  { %v28_v12 = vmul.f32 0.003921569, %v27_v11 }
 0x12a   :  { %75 = vrsqrt.f32 %v28_v12  ;;  %vm31_vm0 = vcmp.eq.f32.partialorder %v28_v12, inf  ;;  %v34_v15 = vand.u32 2147483648, %v28_v12  ;;  %vm33_vm1 = vcmp.eq.f32.partialorder %v28_v12, 0.0 }
 0x134   :  { %v76_v13 = vpop.eup %75 }
 0x135   :  { %v30_v14 = vmul.f32 %v76_v13, %v28_v12 }
 0x137   :  { %v32_v16 = vsel %vm31_vm0, %v28_v12, %v30_v14 }
 0x138   :  { %v35_v17 = vsel %vm33_vm1, %v34_v15, %v32_v16 }
 0x139   :  { %v36_v18 = vadd.f32 1e-07, %v35_v17 }
 0x13b   :  { %77 = vrcp.f32 %v36_v18 }
 0x145   :  { %v78_v20 = vpop.eup %77 }
 0x146   :  { %v39_v21 = vmul.f32 %v78_v20, %v37_v19 }
 0x148   :  { %42 = vperm.xlu1 %73, %v39_v21  }
 0x14c   :  { %50 = vperm.xlu1 %73, %v47_v22  }
 0x1c7   :  { %v43_v23 = vpop.permute.xlu1 %42 }
 0x1c8   :  { %v45_v24 = vmul.f32 %v43_v23, %v21_v5  ;;  %v46_v25 = vmul.f32 %v43_v23, %v22_v6 }
 0x1cb   :  { %v51_v26 = vpop.permute.xlu1 %50 }
 0x1cc   :  { %v53_v27 = vadd.f32 %v51_v26, %v45_v24  ;;  %v54_v28 = vadd.f32 %v51_v26, %v46_v25 }
 0x1ce   :  { %55 = vst [vmem:[#allocation2] sm:$0xff] %v53_v27  ;;  %56 = vst [vmem:[#allocation2 + $0x8] sm:$0xff] %v54_v28 }
 0x1cf   :  { %90 = shalt.err (!%p87_p4)
}
 0x1d0   :  { %s91_s22 = scalar_lea.hbm %s152_s3, 256 }
 0x1d1   :  { %p92_p5 = scmp.ne.s32.totalorder %s152_s3, %s91_s22  ;;  %p95_p6 = scmp.lt.u32.totalorder %s91_s22, %s152_s3 }
 0x1d3   :  { %p97_p7 = pnand %p95_p6, %p92_p5 }
 0x1d5   :  { %100 = shalt.err (!%p97_p7)
}
 0x1d6   :  { %66 = dma.vmem_to_hbm [thread:$0]  %s64_s20, 256, %s152_s3, [#allocation3]  }
 0x1d7   :  { %101 = dma.done.wait [#allocation3], 256  }
 0x1d8   :  { %102 = vsyncadd [#allocation3], 4294967040 }
 0x1d9   :  { %70 = vsyncpa [#allocation3], 1 }

</bundles_post_ra>
